<compile_context>
chip_gen: v7x
topology: tpu7x:2x2x1
jax: 0.10.0
libtpu: 0.0.40
codegen_flags: <defaults>
</compile_context>

<pallas_src>
import jax
import jax.numpy as jnp
from jax.experimental import pallas as pl
from jax.experimental.pallas import tpu as pltpu


def policy_net_kernel(x_ref, w1_ref, b1_ref, w2_ref, b2_ref, out_ref):
    # x: [tb, S]   w1: [S, H]   b1: [1, H]   w2: [H, A_pad]   b2: [1, A_pad]
    x = x_ref[...].astype(jnp.bfloat16)
    w1 = w1_ref[...].astype(jnp.bfloat16)

    # fc1 + ReLU — bf16 MXU operands, f32 accumulation, f32 elementwise.
    h = jnp.dot(x, w1, preferred_element_type=jnp.float32) + b1_ref[...]
    h = jnp.maximum(h, 0.0)

    # fc2 — same bf16-operand / f32-accumulate recipe.
    logits = jnp.dot(
        h.astype(jnp.bfloat16),
        w2_ref[...].astype(jnp.bfloat16),
        preferred_element_type=jnp.float32,
    ) + b2_ref[...]

    # Numerically-stable softmax along the last axis (PyTorch dim=1).
    # Padded action columns carry bias -1e30 -> exp() == 0 -> no softmax mass.
    m = jnp.max(logits, axis=-1, keepdims=True)
    e = jnp.exp(logits - m)
    denom = jnp.sum(e, axis=-1, keepdims=True)
    out_ref[...] = (e * pl.reciprocal(denom, approx=True)).astype(out_ref.dtype)


def _round_up(n, m):
    return ((n + m - 1) // m) * m


def policy_net_forward(x, w1, b1, w2, b2, *, block_rows=512):
    """x: [B, state_dim]; weights already stored as [in, out]
    (w1: [S, H], b1: [1, H], w2: [H, A], b2: [1, A]).
    Returns [B, action_dim] action probabilities (float32)."""
    B, S = x.shape
    H, A = w2.shape

    # Lane-dense output: pad the action dim to a multiple of 128.  Pad columns
    # get zero weights and a -1e30 bias so they receive exactly 0 probability.
    A_pad = _round_up(A, 128)
    if A_pad != A:
        w2 = jnp.pad(w2, ((0, 0), (0, A_pad - A)))
        b2 = jnp.pad(b2, ((0, 0), (0, A_pad - A)), constant_values=-1e30)

    # Tile the (possibly large, fused-rollout) batch axis.  f32 sublane = 8.
    tb = min(block_rows, _round_up(B, 8))
    B_pad = _round_up(B, tb)
    if B_pad != B:
        x = jnp.pad(x, ((0, B_pad - B), (0, 0)))

    out = pl.pallas_call(
        policy_net_kernel,
        out_shape=jax.ShapeDtypeStruct((B_pad, A_pad), jnp.float32),
        grid=(B_pad // tb,),
        in_specs=[
            pl.BlockSpec((tb, S), lambda i: (i, 0)),      # x tiled over batch
            pl.BlockSpec((S, H), lambda i: (0, 0)),       # weights stay VMEM-resident
            pl.BlockSpec((1, H), lambda i: (0, 0)),
            pl.BlockSpec((H, A_pad), lambda i: (0, 0)),
            pl.BlockSpec((1, A_pad), lambda i: (0, 0)),
        ],
        out_specs=pl.BlockSpec((tb, A_pad), lambda i: (i, 0)),
        compiler_params=pltpu.CompilerParams(
            dimension_semantics=("parallel",),            # v7x: 2 TCs split the batch
        ),
    )(x, w1, b1, w2, b2)
    return out[:B, :A]


def init_params(key, state_dim, hidden_dim, action_dim):
    """Deterministic init mimicking nn.Linear's U(-1/sqrt(fan_in), 1/sqrt(fan_in))."""
    k1, k2, k3, k4 = jax.random.split(key, 4)
    bound1 = 1.0 / jnp.sqrt(state_dim)
    bound2 = 1.0 / jnp.sqrt(hidden_dim)
    # Stored directly as [in, out] (i.e. PyTorch weight transposed).
    w1 = jax.random.uniform(k1, (state_dim, hidden_dim), jnp.float32, -bound1, bound1)
    b1 = jax.random.uniform(k2, (1, hidden_dim), jnp.float32, -bound1, bound1)
    w2 = jax.random.uniform(k3, (hidden_dim, action_dim), jnp.float32, -bound2, bound2)
    b2 = jax.random.uniform(k4, (1, action_dim), jnp.float32, -bound2, bound2)
    return w1, b1, w2, b2


def reference_forward(x, w1, b1, w2, b2):
    h = jnp.maximum(x @ w1 + b1, 0.0)
    logits = h @ w2 + b2
    return jax.nn.softmax(logits, axis=1)


if __name__ == "__main__":
    # CartPole-v0: state_dim = 4, action_dim = 2, hidden_dim = 128.
    # batch = 200 stands in for T*B fused rollout rows (amortizes launch cost)
    # and deliberately isn't a multiple of the 128-row tile so the batch-pad /
    # slice path is exercised (grid of 2 tiles of 128 rows).
    state_dim, hidden_dim, action_dim = 4, 128, 2
    batch = 200

    key = jax.random.PRNGKey(0)
    k_params, k_x = jax.random.split(key)
    w1, b1, w2, b2 = init_params(k_params, state_dim, hidden_dim, action_dim)
    x = jax.random.normal(k_x, (batch, state_dim), jnp.float32)

    probs = policy_net_forward(x, w1, b1, w2, b2, block_rows=128)
    probs = jax.block_until_ready(probs)

    ref = reference_forward(x, w1, b1, w2, b2)
    assert probs.shape == (batch, action_dim)
    # bf16 MXU operands + approx reciprocal => loose-but-meaningful tolerance
    # against the pure-f32 reference.
    assert jnp.allclose(probs, ref, atol=2e-2, rtol=2e-2)
    assert jnp.allclose(jnp.sum(probs, axis=1), 1.0, atol=5e-3)

    print("KERNEL_OK")
</pallas_src>

<mosaic_0001>
module attributes {stable_mosaic.version = 11 : i64} {
  func.func @policy_net_kernel(%arg0: i32, %arg1: memref<128x4xf32, #tpu.memory_space<vmem>>, %arg2: memref<4x128xf32, #tpu.memory_space<vmem>>, %arg3: memref<1x128xf32, #tpu.memory_space<vmem>>, %arg4: memref<128x128xf32, #tpu.memory_space<vmem>>, %arg5: memref<1x128xf32, #tpu.memory_space<vmem>>, %arg6: memref<128x128xf32, #tpu.memory_space<vmem>>) attributes {dimension_semantics = [#tpu.dimension_semantics<parallel>], iteration_bounds = array<i64: 2>, scalar_prefetch = 0 : i64, scratch_operands = 0 : i64, tpu.core_type = #tpu.core_type<tc>, window_params = [{transform_indices = @transform_0, window_bounds = array<i64: 128, 4>}, {pipeline_mode = #tpu.pipeline_mode<synchronous>, transform_indices = @transform_1, window_bounds = array<i64: 4, 128>}, {pipeline_mode = #tpu.pipeline_mode<synchronous>, transform_indices = @transform_2, window_bounds = array<i64: 1, 128>}, {pipeline_mode = #tpu.pipeline_mode<synchronous>, transform_indices = @transform_3, window_bounds = array<i64: 128, 128>}, {pipeline_mode = #tpu.pipeline_mode<synchronous>, transform_indices = @transform_4, window_bounds = array<i64: 1, 128>}, {transform_indices = @transform_5, window_bounds = array<i64: 128, 128>}]} {
    %c0 = arith.constant 0 : index
    %c0_0 = arith.constant 0 : index
    %0 = vector.load %arg1[%c0, %c0_0] : memref<128x4xf32, #tpu.memory_space<vmem>>, vector<128x4xf32>
    %1 = arith.truncf %0 : vector<128x4xf32> to vector<128x4xbf16>
    %c0_1 = arith.constant 0 : index
    %c0_2 = arith.constant 0 : index
    %2 = vector.load %arg2[%c0_1, %c0_2] : memref<4x128xf32, #tpu.memory_space<vmem>>, vector<4x128xf32>
    %3 = arith.truncf %2 : vector<4x128xf32> to vector<4x128xbf16>
    %cst = arith.constant dense<0.000000e+00> : vector<128x128xf32>
    %4 = tpu.matmul %1, %3, %cst {dimension_numbers = #tpu.dot_dimension_numbers<[1], [0], [0], [1], [0, 0, 1, 1], [], []>} : vector<128x4xbf16>, vector<4x128xbf16>, vector<128x128xf32> -> vector<128x128xf32>
    %c0_3 = arith.constant 0 : index
    %c0_4 = arith.constant 0 : index
    %5 = vector.load %arg3[%c0_3, %c0_4] : memref<1x128xf32, #tpu.memory_space<vmem>>, vector<1x128xf32>
    %6 = vector.broadcast %5 : vector<1x128xf32> to vector<128x128xf32>
    %7 = arith.addf %4, %6 : vector<128x128xf32>
    %cst_5 = arith.constant 0.000000e+00 : f32
    %8 = vector.broadcast %cst_5 : f32 to vector<128x128xf32>
    %9 = arith.maximumf %7, %8 : vector<128x128xf32>
    %10 = arith.truncf %9 : vector<128x128xf32> to vector<128x128xbf16>
    %c0_6 = arith.constant 0 : index
    %c0_7 = arith.constant 0 : index
    %11 = vector.load %arg4[%c0_6, %c0_7] : memref<128x128xf32, #tpu.memory_space<vmem>>, vector<128x128xf32>
    %12 = arith.truncf %11 : vector<128x128xf32> to vector<128x128xbf16>
    %cst_8 = arith.constant dense<0.000000e+00> : vector<128x128xf32>
    %13 = tpu.matmul %10, %12, %cst_8 {dimension_numbers = #tpu.dot_dimension_numbers<[1], [0], [0], [1], [0, 0, 1, 1], [], []>} : vector<128x128xbf16>, vector<128x128xbf16>, vector<128x128xf32> -> vector<128x128xf32>
    %c0_9 = arith.constant 0 : index
    %c0_10 = arith.constant 0 : index
    %14 = vector.load %arg5[%c0_9, %c0_10] : memref<1x128xf32, #tpu.memory_space<vmem>>, vector<1x128xf32>
    %15 = vector.broadcast %14 : vector<1x128xf32> to vector<128x128xf32>
    %16 = arith.addf %13, %15 : vector<128x128xf32>
    %cst_11 = arith.constant dense<0xFF800000> : vector<128xf32>
    %17 = vector.multi_reduction <maximumf>, %16, %cst_11 [1] : vector<128x128xf32> to vector<128xf32>
    %18 = vector.shape_cast %17 : vector<128xf32> to vector<128x1xf32>
    %19 = vector.broadcast %18 : vector<128x1xf32> to vector<128x128xf32>
    %20 = arith.subf %16, %19 : vector<128x128xf32>
    %21 = math.exp %20 : vector<128x128xf32>
    %cst_12 = arith.constant dense<0.000000e+00> : vector<128xf32>
    %22 = vector.multi_reduction <add>, %21, %cst_12 [1] : vector<128x128xf32> to vector<128xf32>
    %23 = vector.shape_cast %22 : vector<128xf32> to vector<128x1xf32>
    %24 = tpu.reciprocal %23 {approx = true} : vector<128x1xf32> -> vector<128x1xf32>
    %25 = vector.broadcast %24 : vector<128x1xf32> to vector<128x128xf32>
    %26 = arith.mulf %21, %25 : vector<128x128xf32>
    %c0_13 = arith.constant 0 : index
    %c0_14 = arith.constant 0 : index
    %27 = vector.load %arg6[%c0_13, %c0_14] : memref<128x128xf32, #tpu.memory_space<vmem>>, vector<128x128xf32>
    tpu.vector_store %arg6[%c0_13, %c0_14], %26 {strides = array<i32>} : memref<128x128xf32, #tpu.memory_space<vmem>>, vector<128x128xf32>,
    return
  }
  func.func @transform_0(%arg0: i32) -> (i32, i32) {
    %c0_i32 = arith.constant 0 : i32
    %c0_i32_0 = arith.constant 0 : i32
    return %arg0, %c0_i32 : i32, i32
  }
  func.func @transform_1(%arg0: i32) -> (i32, i32) {
    %c0_i32 = arith.constant 0 : i32
    %c0_i32_0 = arith.constant 0 : i32
    %c0_i32_1 = arith.constant 0 : i32
    return %c0_i32, %c0_i32_0 : i32, i32
  }
  func.func @transform_2(%arg0: i32) -> (i32, i32) {
    %c0_i32 = arith.constant 0 : i32
    %c0_i32_0 = arith.constant 0 : i32
    %c0_i32_1 = arith.constant 0 : i32
    return %c0_i32, %c0_i32_0 : i32, i32
  }
  func.func @transform_3(%arg0: i32) -> (i32, i32) {
    %c0_i32 = arith.constant 0 : i32
    %c0_i32_0 = arith.constant 0 : i32
    %c0_i32_1 = arith.constant 0 : i32
    return %c0_i32, %c0_i32_0 : i32, i32
  }
  func.func @transform_4(%arg0: i32) -> (i32, i32) {
    %c0_i32 = arith.constant 0 : i32
    %c0_i32_0 = arith.constant 0 : i32
    %c0_i32_1 = arith.constant 0 : i32
    return %c0_i32, %c0_i32_0 : i32, i32
  }
  func.func @transform_5(%arg0: i32) -> (i32, i32) {
    %c0_i32 = arith.constant 0 : i32
    %c0_i32_0 = arith.constant 0 : i32
    return %arg0, %c0_i32 : i32, i32
  }
}

</mosaic_0001>

<bundles_post_ra>
// kernel: tpu_custom_call.1
= control target key start
LH: loop header
LB: loop body
LE: loop exit
PB: predicated region body
PF: predicated region fallthrough
CT: control target
= control target key end

     0   :  { %10 = vsyncpa [#allocation3], 0  ;;  %s1395_s0 = inlined_call_operand.vmem [shape: f32[256,4], index: 0, kind: input, shape index: {}]   ;;  %s1396_s1 = inlined_call_operand.vmem [shape: f32[4,128], index: 1, kind: input, shape index: {}]   ;;  %s1397_s2 = inlined_call_operand.vmem [shape: f32[1,128], index: 2, kind: input, shape index: {}]   ;;  %s1398_s3 = inlined_call_operand.vmem [shape: f32[128,128], index: 3, kind: input, shape index: {}]   ;;  %s1399_s4 = inlined_call_operand.vmem [shape: f32[1,128], index: 4, kind: input, shape index: {}]   ;;  %s1400_s5 = inlined_call_operand.hbm [shape: f32[256,128], index: 5, kind: output, shape index: {}]  }
   0x1   :  { %12 = vsyncpa [#allocation3 + $0x1], 0  ;;  %s1091_s18 = smov 0   ;;  %s1093_s19 = smov 0  }
   0x2   :  { %s1095_s20 = smov 0   ;;  %s1097_s21 = smov 0  }
   0x3 LB: > { %s1112_s22 = sadd.s32 4294967295, %s1056_s21   ;;  %s774_s23 = sadd.s32 4294967294, %s1056_s21   ;;  %s1056_s21 = sphi %s1097_s21, %s1406_s21   ;;  %s1052_s20 = sphi %s1095_s20, %s1405_s20   ;;  %s1048_s19 = sphi %s1093_s19, %s1404_s19   ;;  %s1044_s18 = sphi %s1091_s18, %s1403_s18  }
   0x4   : > { %s1116_s24 = sadd.s32 1, %s1056_s21   ;;  %s135_s25 = sadd.s32 1, %s1052_s20 }
   0x5   : > { %s132_s26 = ssub.s32 %s1056_s21, %s1116_s24  ;;  %p145_p0 = scmp.ne.s32.totalorder %s1052_s20, %s1048_s19 }
   0x6   : > { %p133_p1 = scmp.eq.s32.totalorder %s132_s26, 0  ;;  %p146_p2 = scmp.eq.s32.totalorder %s1112_s22, 1 }
   0x7   : > { %p151_p3 = scmp.ne.s32.totalorder %s1048_s19, %s1044_s18  ;;  %p152_p4 = scmp.eq.s32.totalorder %s774_s23, 1 }
   0x8   : > { %s1127_s27 = scalar_select %p133_p1, %s1052_s20, %s135_s25  }
   0x9   : > { %p1129_p5 = por %p146_p2, %p145_p0  ;;  %p1133_p6 = por %p152_p4, %p151_p3 }
   0xa   : > { %p777_p7 = scmp.ge.s32.totalorder %s1056_s21, 1  ;;  %p191_p8 = scmp.lt.s32.totalorder %s1056_s21, 3 }
   0xc   : > { %p192_p9 = pnand %p777_p7, %p191_p8 }
   0xd   : > { %v251_v0 = vld [vmem:[%s1396_s1] sm:$0xf] (!%p192_p9)  ;;  %vm285_vm0 = vcmask (!%p192_p9), 1041408   ;;  %s779_s7 = sshll.u32 (!%p192_p9), %s1112_s22, 4  ;;  %v411_v3 = vld [vmem:[%s1398_s3 + $0x8] sm:$0xff] (!%p192_p9)  ;;  %v412_v4 = vld [vmem:[%s1398_s3 + $0x10] sm:$0xff] (!%p192_p9) }
   0xe   : > { %195 = sbr.rel (%p192_p9) target bundleno = 823 (0x337), region = 40  ;;  %v410_v1 = vld [vmem:[%s1398_s3] sm:$0xff] (!%p192_p9)  ;;  %v252_v2 = vpack.c.bf16 (!%p192_p9), %v251_v0, %v251_v0  ;;  %p220_p10 = scmp.lt.s32.totalorder (!%p192_p9), %s779_s7, 31  ;;  %v413_v5 = vld [vmem:[%s1398_s3 + $0x18] sm:$0xff] (!%p192_p9)  ;;  %v415_v10 = vld [vmem:[%s1398_s3 + $0x28] sm:$0xff] (!%p192_p9)  ;;  %vm260_vm1 = vcmask (!%p192_p9), 31744  }
   0xf   : > { %v426_v6 = vpack.c.bf16 (!%p192_p9), %v411_v3, %v410_v1  ;;  %v427_v8 = vpack.c.bf16 (!%p192_p9), %v413_v5, %v412_v4  ;;  %v414_v9 = vld [vmem:[%s1398_s3 + $0x20] sm:$0xff] (!%p192_p9)  ;;  %v416_v21 = vld [vmem:[%s1398_s3 + $0x30] sm:$0xff] (!%p192_p9)  ;;  %v417_v22 = vld [vmem:[%s1398_s3 + $0x38] sm:$0xff] (!%p192_p9)  ;;  %s796_s25 = sshll.u32 (!%p192_p9), %s1112_s22, 11 }
  0x10   : > { %888 = vmatprep.subr.msk.bf16.mxu0 (!%p192_p9), %vm285_vm0, %v252_v2  ;;  %v287_v7 = vsel (!%p192_p9), %vm285_vm0, %v252_v2, 0  ;;  %v428_v18 = vpack.c.bf16 (!%p192_p9), %v415_v10, %v414_v9  ;;  %v429_v25 = vpack.c.bf16 (!%p192_p9), %v417_v22, %v416_v21  ;;  %v418_v26 = vld [vmem:[%s1398_s3 + $0x40] sm:$0xff] (!%p192_p9)  ;;  %v419_v29 = vld [vmem:[%s1398_s3 + $0x48] sm:$0xff] (!%p192_p9)  ;;  %v420_v33 = vld [vmem:[%s1398_s3 + $0x50] sm:$0xff] (!%p192_p9) }
  0x11   : > { %823 = vmatpush3.bf16.msra.mxu0 (!%p192_p9), %v287_v7  ;;  %872 = vmatprep.subr.bf16.mxu1 (!%p192_p9), %v426_v6  ;;  %v430_v32 = vpack.c.bf16 (!%p192_p9), %v419_v29, %v418_v26  ;;  %v421_v34 = vld [vmem:[%s1398_s3 + $0x58] sm:$0xff] (!%p192_p9)  ;;  %v422_v45 = vld [vmem:[%s1398_s3 + $0x60] sm:$0xff] (!%p192_p9)  ;;  %v423_v46 = vld [vmem:[%s1398_s3 + $0x68] sm:$0xff] (!%p192_p9) }
  0x12   : > { %840 = vmatprep.subr.bf16.mxu0 (!%p192_p9), %v426_v6  ;;  %880 = vmatpush3.bf16.msra.mxu1 (!%p192_p9), %v426_v6  ;;  %v431_v37 = vpack.c.bf16 (!%p192_p9), %v421_v34, %v420_v33  ;;  %v432_v47 = vpack.c.bf16 (!%p192_p9), %v423_v46, %v422_v45  ;;  %v424_v48 = vld [vmem:[%s1398_s3 + $0x70] sm:$0xff] (!%p192_p9)  ;;  %v425_v49 = vld [vmem:[%s1398_s3 + $0x78] sm:$0xff] (!%p192_p9)  ;;  %v781_v51 = vld [vmem:[%s1397_s2] ss:$0 sm:$0xff] (!%p192_p9) }
  0x13   : > { %873 = vmatprep.subr.bf16.mxu1 (!%p192_p9), %v427_v8  ;;  %v433_v50 = vpack.c.bf16 (!%p192_p9), %v425_v49, %v424_v48 }
  0x15   : > { %s1408_s7 = smov (!%p220_p10, %s779_s7), 31 }
  0x16   : > { %s780_s16 = sshll.u32 %s1408_s7, 3  ;;  %881 = vmatpush3.bf16.msra.mxu1 %v427_v8  ;;  %s1346_s7 = scalar_lea.hbm %s1400_s5, %s796_s25 }
  0x17   : > { %s1164_s8 = scalar_lea.vmem %s1395_s0, %s780_s16  ;;  %874 = vmatprep.subr.bf16.mxu1 %v428_v18  ;;  %s216_s16 = sand.u32 1, %s1048_s19  }
  0x18   : > { %v227_v11 = vld [vmem:[%s1164_s8] sm:$0xff]  ;;  %v228_v12 = vld [vmem:[%s1164_s8 + $0x8] sm:$0xff]  ;;  %v229_v13 = vld [vmem:[%s1164_s8 + $0x10] sm:$0xff]  ;;  %s778_s17 = sshll.u32 %s216_s16, 7  ;;  %s1354_s22 = scalar_lea.sflag [#allocation3], %s216_s16 }
  0x19   : > { %v243_v14 = vpack.c.bf16 %v228_v12, %v227_v11  ;;  %v230_v15 = vld [vmem:[%s1164_s8 + $0x18] sm:$0xff]  ;;  %v231_v16 = vld [vmem:[%s1164_s8 + $0x20] sm:$0xff]  ;;  %v232_v17 = vld [vmem:[%s1164_s8 + $0x28] sm:$0xff]  ;;  %s1310_s23 = scalar_lea.vmem [#allocation2], %s778_s17 }
  0x1a   : > { %v244_v19 = vpack.c.bf16 %v230_v15, %v229_v13  ;;  %v245_v20 = vpack.c.bf16 %v232_v17, %v231_v16  ;;  %v233_v23 = vld [vmem:[%s1164_s8 + $0x30] sm:$0xff]  ;;  %v234_v24 = vld [vmem:[%s1164_s8 + $0x38] sm:$0xff]  ;;  %v235_v27 = vld [vmem:[%s1164_s8 + $0x40] sm:$0xff]  ;;  %882 = vmatpush3.bf16.msra.mxu1 %v428_v18  ;;  %s712_s26 = sshll.u32 %s1310_s23, 4  ;;  %s1348_s26 = int_to_ptr.vmem [resolvable:$true] %s712_s26 }
  0x1b   : > { %824 = vmatprep.mubr.msk.bf16.mxu0 %vm260_vm1, %v243_v14  ;;  %v236_v28 = vld [vmem:[%s1164_s8 + $0x48] sm:$0xff]  ;;  %875 = vmatprep.subr.bf16.mxu1 %v429_v25  ;;  %v246_v30 = vpack.c.bf16 %v234_v24, %v233_v23  ;;  %v237_v35 = vld [vmem:[%s1164_s8 + $0x50] sm:$0xff]  ;;  %v238_v36 = vld [vmem:[%s1164_s8 + $0x58] sm:$0xff]  ;;  %s994_s9 = scalar_lea.vmem %s1348_s26, 2048 }
  0x1c   : > { %825 = vmatmul.mubr.msk.bf16.vlgmr.msra.gmra.mrb[0].mxu0 %vm260_vm1, %v244_v19  ;;  %v247_v31 = vpack.c.bf16 %v236_v28, %v235_v27  ;;  %v239_v38 = vld [vmem:[%s1164_s8 + $0x60] sm:$0xff]  ;;  %v240_v39 = vld [vmem:[%s1164_s8 + $0x68] sm:$0xff]  ;;  %v248_v40 = vpack.c.bf16 %v238_v36, %v237_v35  ;;  %v241_v42 = vld [vmem:[%s1164_s8 + $0x70] sm:$0xff]  ;;  %p995_p11 = scmp.ne.s32.totalorder %s1348_s26, %s994_s9 }
  0x1d   : > { %828 = vmatprep.mubr.msk.bf16.mxu0 %vm260_vm1, %v245_v20  ;;  %841 = vmatpush3.bf16.msra.mxu0 %v426_v6  ;;  %v249_v41 = vpack.c.bf16 %v240_v39, %v239_v38  ;;  %v242_v43 = vld [vmem:[%s1164_s8 + $0x78] sm:$0xff]  ;;  %s1058_s8 = smov [#allocation2]  }
  0x1e   : > { %842 = vmatprep.subr.bf16.mxu0 %v427_v8  ;;  %883 = vmatpush3.bf16.msra.mxu1 %v429_v25  ;;  %v250_v44 = vpack.c.bf16 %v242_v43, %v241_v42  ;;  %p996_p12 = pnand %p995_p11, %p1129_p5  ;;  %s998_s10 = sshll.u32 %s1058_s8, 4  ;;  %s999_s10 = int_to_ptr.vmem [resolvable:$false] %s998_s10 }
  0x1f   : > { %876 = vmatprep.subr.bf16.mxu1 %v430_v32  ;;  %s1000_s11 = scalar_lea.vmem %s999_s10, 4096  ;;  %p1001_p0 = scmp.lt.s32.totalorder %s1348_s26, %s999_s10 }
  0x20   : > { %p997_p13 = pneg %p996_p12  ;;  %p1002_p1 = scmp.lt.s32.totalorder %s1000_s11, %s994_s9 }
  0x21   : > { %843 = vmatpush3.bf16.msra.mxu0 %v427_v8 }
  0x22   : > { %844 = vmatprep.subr.bf16.mxu0 %v428_v18  ;;  %884 = vmatpush3.bf16.msra.mxu1 %v430_v32  ;;  %p1003_p2 = por %p1002_p1, %p1001_p0 }
  0x23   : > { %877 = vmatprep.subr.bf16.mxu1 %v431_v37 }
  0x24   : > { %829 = vmatmul.mubr.msk.bf16.gmra.mrb[4].mxu0 %vm260_vm1, %v246_v30  ;;  %p1004_p3 = pnand %p1003_p2, %p997_p13 }
  0x25   : > { %832 = vmatprep.mubr.msk.bf16.mxu0 %vm260_vm1, %v247_v31  ;;  %845 = vmatpush3.bf16.msra.mxu0 %v428_v18 }
  0x26   : > { %846 = vmatprep.subr.bf16.mxu0 %v429_v25  ;;  %885 = vmatpush3.bf16.msra.mxu1 %v431_v37 }
  0x27   : > { %878 = vmatprep.subr.bf16.mxu1 %v432_v47 }
  0x29   : > { %847 = vmatpush3.bf16.msra.mxu0 %v429_v25 }
  0x2a   : > { %848 = vmatprep.subr.bf16.mxu0 %v430_v32  ;;  %886 = vmatpush3.bf16.msra.mxu1 %v432_v47 }
  0x2b   : > { %879 = vmatprep.subr.bf16.mxu1 %v433_v50 }
  0x2c   : > { %833 = vmatmul.mubr.msk.bf16.gmra.mrb[8].mxu0 %vm260_vm1, %v248_v40 }
  0x2d   : > { %836 = vmatprep.mubr.msk.bf16.mxu0 %vm260_vm1, %v249_v41  ;;  %849 = vmatpush3.bf16.msra.mxu0 %v430_v32 }
  0x2e   : > { %850 = vmatprep.subr.bf16.mxu0 %v431_v37  ;;  %887 = vmatpush3.bf16.msra.mxu1 %v433_v50 }
  0x31   : > { %851 = vmatpush3.bf16.msra.mxu0 %v431_v37 }
  0x32   : > { %852 = vmatprep.subr.bf16.mxu0 %v432_v47 }
  0x34   : > { %837 = vmatmul.mubr.msk.bf16.gmra.mrb[12].mxu0 %vm260_vm1, %v250_v44  ;;  %v790_v44 = vld [vmem:[%s1399_s4] ss:$0 sm:$0xff] }
  0x35   : > { %853 = vmatpush3.bf16.msra.mxu0 %v432_v47 }
  0x36   : > { %854 = vmatprep.subr.bf16.mxu0 %v433_v50 }
  0x39   : > { %855 = vmatpush3.bf16.msra.mxu0 %v433_v50 }
  0xef   : > { %v826_v52 = vpop.f32.mrb[0].mxu0 }
  0xf0   : > { %v332_v53 = vadd.f32 %v826_v52, %v781_v51  ;;  %v323_v54 = vpop.f32.mrb[1].mxu0 }
  0xf1   : > { %v324_v55 = vadd.f32 %v781_v51, %v323_v54  ;;  %v827_v56 = vpop.f32.mrb[2].mxu0 }
  0xf2   : > { %v335_v57 = vadd.f32 %v827_v56, %v781_v51  ;;  %v326_v58 = vpop.f32.mrb[3].mxu0  ;;  %v388_v60 = vmax.f32 %v332_v53, 0.0 }
  0xf3   : > { %v327_v59 = vadd.f32 %v781_v51, %v326_v58  ;;  %v386_v62 = vmax.f32 %v324_v55, 0.0 }
  0xf4   : > { %v389_v61 = vmax.f32 %v335_v57, 0.0 }
  0xf5   : > { %v387_v63 = vmax.f32 %v327_v59, 0.0 }
  0xf6   : > { %v403_v0 = vpack.c.bf16 %v389_v61, %v388_v60 }
  0xf7   : > { %v402_v1 = vpack.c.bf16 %v387_v63, %v386_v62  ;;  %v830_v2 = vpop.f32.mrb[4].mxu0 }
  0xf8   : > { %v348_v3 = vadd.f32 %v830_v2, %v781_v51  ;;  %v339_v4 = vpop.f32.mrb[5].mxu0 }
  0xf9   : > { %v340_v5 = vadd.f32 %v781_v51, %v339_v4  ;;  %v831_v6 = vpop.f32.mrb[6].mxu0  ;;  %856 = vmatprep.mubr.bf16.mxu0 %v402_v1 }
  0xfa   : > { %v392_v7 = vmax.f32 %v348_v3, 0.0  ;;  %v351_v8 = vadd.f32 %v831_v6, %v781_v51  ;;  %v342_v9 = vpop.f32.mrb[7].mxu0  ;;  %857 = vmatmul.mubr.bf16.vlgmr.msra.gmra.mrb[16].mxu0 %v403_v0 }
  0xfb   : > { %v343_v10 = vadd.f32 %v781_v51, %v342_v9  ;;  %v390_v12 = vmax.f32 %v340_v5, 0.0 }
  0xfc   : > { %v393_v11 = vmax.f32 %v351_v8, 0.0 }
  0xfd   : > { %v391_v13 = vmax.f32 %v343_v10, 0.0 }
  0xfe   : > { %v405_v14 = vpack.c.bf16 %v393_v11, %v392_v7 }
  0xff   : > { %v834_v15 = vpop.f32.mrb[8].mxu0  ;;  %v404_v16 = vpack.c.bf16 %v391_v13, %v390_v12 }
 0x100   : > { %v364_v17 = vadd.f32 %v834_v15, %v781_v51  ;;  %v355_v18 = vpop.f32.mrb[9].mxu0 }
 0x101   : > { %v356_v19 = vadd.f32 %v781_v51, %v355_v18  ;;  %v835_v20 = vpop.f32.mrb[10].mxu0  ;;  %860 = vmatprep.mubr.bf16.mxu1 %v404_v16 }
 0x102   : > { %v396_v21 = vmax.f32 %v364_v17, 0.0  ;;  %v367_v22 = vadd.f32 %v835_v20, %v781_v51  ;;  %v358_v23 = vpop.f32.mrb[11].mxu0  ;;  %861 = vmatmul.mubr.bf16.vlgmr.msra.gmra.mrb[0].mxu1 %v405_v14 }
 0x103   : > { %v359_v24 = vadd.f32 %v781_v51, %v358_v23  ;;  %v394_v26 = vmax.f32 %v356_v19, 0.0 }
 0x104   : > { %v397_v25 = vmax.f32 %v367_v22, 0.0 }
 0x105   : > { %v395_v27 = vmax.f32 %v359_v24, 0.0 }
 0x106   : > { %v407_v28 = vpack.c.bf16 %v397_v25, %v396_v21 }
 0x107   : > { %v406_v29 = vpack.c.bf16 %v395_v27, %v394_v26  ;;  %v838_v30 = vpop.f32.mrb[12].mxu0 }
 0x108   : > { %v380_v31 = vadd.f32 %v838_v30, %v781_v51  ;;  %v371_v32 = vpop.f32.mrb[13].mxu0 }
 0x109   : > { %v372_v33 = vadd.f32 %v781_v51, %v371_v32  ;;  %v839_v34 = vpop.f32.mrb[14].mxu0  ;;  %864 = vmatprep.mubr.bf16.mxu1 %v406_v29 }
 0x10a   : > { %v400_v35 = vmax.f32 %v380_v31, 0.0  ;;  %v383_v36 = vadd.f32 %v839_v34, %v781_v51  ;;  %v374_v37 = vpop.f32.mrb[15].mxu0  ;;  %865 = vmatmul.mubr.bf16.gmra.mrb[4].mxu1 %v407_v28 }
 0x10b   : > { %v375_v38 = vadd.f32 %v781_v51, %v374_v37  ;;  %v398_v40 = vmax.f32 %v372_v33, 0.0 }
 0x10c   : > { %v401_v39 = vmax.f32 %v383_v36, 0.0 }
 0x10d   : > { %v399_v41 = vmax.f32 %v375_v38, 0.0 }
 0x10e   : > { %v409_v42 = vpack.c.bf16 %v401_v39, %v400_v35 }
 0x10f   : > { %v408_v43 = vpack.c.bf16 %v399_v41, %v398_v40 }
 0x111   : > { %868 = vmatprep.mubr.bf16.mxu1 %v408_v43 }
 0x112   : > { %869 = vmatmul.mubr.bf16.gmra.mrb[8].mxu1 %v409_v42 }
 0x1cd   : > { %v858_v45 = vpop.f32.mrb[16].mxu0 }
 0x1ce   : > { %v484_v46 = vadd.f32 %v858_v45, %v790_v44  ;;  %v475_v47 = vpop.f32.mrb[17].mxu0 }
 0x1cf   : > { %v476_v48 = vadd.f32 %v790_v44, %v475_v47  ;;  %v859_v49 = vpop.f32.mrb[18].mxu0 }
 0x1d0   : > { %542 = vmax.xlane.f32.xlu1 %v484_v46  ;;  %v478_v50 = vpop.f32.mrb[19].mxu0  ;;  %v487_v51 = vadd.f32 %v859_v49, %v790_v44 }
 0x1d1   : > { %538 = vmax.xlane.f32.xlu0 %v476_v48  ;;  %v479_v52 = vadd.f32 %v790_v44, %v478_v50 }
 0x1d4   : > { %544 = vmax.xlane.f32.xlu1 %v487_v51 }
 0x1d5   : > { %v862_v53 = vpop.f32.mrb[0].mxu1  ;;  %540 = vmax.xlane.f32.xlu0 %v479_v52 }
 0x1d6   : > { %v500_v54 = vadd.f32 %v862_v53, %v790_v44  ;;  %v491_v55 = vpop.f32.mrb[1].mxu1 }
 0x1d7   : > { %v863_v56 = vpop.f32.mrb[2].mxu1  ;;  %v492_v59 = vadd.f32 %v790_v44, %v491_v55 }
 0x1d8   : > { %v503_v57 = vadd.f32 %v863_v56, %v790_v44  ;;  %v494_v58 = vpop.f32.mrb[3].mxu1 }
 0x1d9   : > { %550 = vmax.xlane.f32.xlu0 %v500_v54  ;;  %v495_v60 = vadd.f32 %v790_v44, %v494_v58 }
 0x1da   : > { %552 = vmax.xlane.f32.xlu1 %v503_v57 }
 0x1dd   : > { %v866_v61 = vpop.f32.mrb[4].mxu1  ;;  %546 = vmax.xlane.f32.xlu0 %v492_v59 }
 0x1de   : > { %v1226_v62 = vadd.f32 %v866_v61, %v790_v44  ;;  %v507_v63 = vpop.f32.mrb[5].mxu1  ;;  %548 = vmax.xlane.f32.xlu1 %v495_v60 }
 0x1df   : > { %v867_v0 = vpop.f32.mrb[6].mxu1  ;;  %v1232_v3 = vadd.f32 %v790_v44, %v507_v63 }
 0x1e0   : > { %v1228_v1 = vadd.f32 %v867_v0, %v790_v44  ;;  %v510_v2 = vpop.f32.mrb[7].mxu1 }
 0x1e1   : > { %558 = vmax.xlane.f32.xlu0 %v1226_v62  ;;  %v1234_v4 = vadd.f32 %v790_v44, %v510_v2 }
 0x1e2   : > { %560 = vmax.xlane.f32.xlu1 %v1228_v1 }
 0x1e5   : > { %v870_v5 = vpop.f32.mrb[8].mxu1  ;;  %554 = vmax.xlane.f32.xlu0 %v1232_v3 }
 0x1e6   : > { %v523_v6 = vpop.f32.mrb[9].mxu1  ;;  %556 = vmax.xlane.f32.xlu1 %v1234_v4  ;;  %v1243_v11 = vadd.f32 %v870_v5, %v790_v44 }
 0x1e7   : > { %v1238_v7 = vadd.f32 %v790_v44, %v523_v6  ;;  %v871_v8 = vpop.f32.mrb[10].mxu1 }
 0x1e8   : > { %v526_v9 = vpop.f32.mrb[11].mxu1  ;;  %v1246_v12 = vadd.f32 %v871_v8, %v790_v44 }
 0x1e9   : > { %v1240_v10 = vadd.f32 %v790_v44, %v526_v9  ;;  %562 = vmax.xlane.f32.xlu0 %v1238_v7 }
 0x1eb   : > { %564 = vmax.xlane.f32.xlu1 %v1240_v10 }
 0x1ed   : > { %566 = vmax.xlane.f32.xlu0 %v1243_v11 }
 0x1ef   : > { %568 = vmax.xlane.f32.xlu1 %v1246_v12 }
 0x25d   : > { %v543_v13 = vpop.xlane.xlu1 %542 }
 0x25e   : > { %v572_v14 = vsub.f32 %v484_v46, %v543_v13  ;;  %v539_v15 = vpop.xlane.xlu0 %538 }
 0x25f   : > { %v570_v16 = vsub.f32 %v476_v48, %v539_v15 }
 0x260   : > { %v590_v17 = vmul.f32 1.442695, %v572_v14 }
 0x261   : > { %v586_v18 = vmul.f32 1.442695, %v570_v16  ;;  %v545_v19 = vpop.xlane.xlu1 %544 }
 0x262   : > { %930 = vpow2.f32 %v590_v17  ;;  %v573_v20 = vsub.f32 %v487_v51, %v545_v19  ;;  %v541_v21 = vpop.xlane.xlu0 %540 }
 0x263   : > { %v571_v22 = vsub.f32 %v479_v52, %v541_v21  ;;  %932 = vpow2.f32 %v586_v18 }
 0x264   : > { %v592_v23 = vmul.f32 1.442695, %v573_v20 }
 0x265   : > { %v588_v24 = vmul.f32 1.442695, %v571_v22 }
 0x266   : > { %934 = vpow2.f32 %v592_v23  ;;  %v551_v25 = vpop.xlane.xlu0 %550 }
 0x267   : > { %v576_v26 = vsub.f32 %v500_v54, %v551_v25  ;;  %v553_v27 = vpop.xlane.xlu1 %552  ;;  %936 = vpow2.f32 %v588_v24 }
 0x268   : > { %v577_v28 = vsub.f32 %v503_v57, %v553_v27 }
 0x269   : > { %v598_v29 = vmul.f32 1.442695, %v576_v26 }
 0x26a   : > { %v600_v30 = vmul.f32 1.442695, %v577_v28  ;;  %v547_v31 = vpop.xlane.xlu0 %546 }
 0x26b   : > { %938 = vpow2.f32 %v598_v29  ;;  %v574_v32 = vsub.f32 %v492_v59, %v547_v31  ;;  %v549_v33 = vpop.xlane.xlu1 %548 }
 0x26c   : > { %v1250_v34 = vpop.eup %930  ;;  %v575_v35 = vsub.f32 %v495_v60, %v549_v33  ;;  %940 = vpow2.f32 %v600_v30 }
 0x26d   : > { %v594_v36 = vmul.f32 1.442695, %v574_v32  ;;  %622 = vadd.xlane.f32.xlu0 %v1250_v34  ;;  %v1253_v39 = vpop.eup %932 }
 0x26e   : > { %v596_v37 = vmul.f32 1.442695, %v575_v35  ;;  %v559_v38 = vpop.xlane.xlu0 %558 }
 0x26f   : > { %942 = vpow2.f32 %v594_v36  ;;  %v580_v40 = vsub.f32 %v1226_v62, %v559_v38  ;;  %v561_v41 = vpop.xlane.xlu1 %560 }
 0x270   : > { %v1256_v42 = vpop.eup %934  ;;  %v581_v43 = vsub.f32 %v1228_v1, %v561_v41  ;;  %944 = vpow2.f32 %v596_v37 }
 0x271   : > { %v606_v44 = vmul.f32 1.442695, %v580_v40  ;;  %624 = vadd.xlane.f32.xlu1 %v1256_v42  ;;  %618 = vadd.xlane.f32.xlu0 %v1253_v39  ;;  %v1262_v49 = vpop.eup %936 }
 0x272   : > { %v608_v45 = vmul.f32 1.442695, %v581_v43  ;;  %v555_v46 = vpop.xlane.xlu0 %554 }
 0x273   : > { %946 = vpow2.f32 %v606_v44  ;;  %v578_v47 = vsub.f32 %v1232_v3, %v555_v46  ;;  %v557_v48 = vpop.xlane.xlu1 %556 }
 0x274   : > { %v579_v50 = vsub.f32 %v1234_v4, %v557_v48  ;;  %948 = vpow2.f32 %v608_v45 }
 0x275   : > { %v1265_v51 = vpop.eup %938  ;;  %v602_v52 = vmul.f32 1.442695, %v578_v47  ;;  %620 = vadd.xlane.f32.xlu1 %v1262_v49 }
 0x276   : > { %v604_v53 = vmul.f32 1.442695, %v579_v50  ;;  %630 = vadd.xlane.f32.xlu0 %v1265_v51  ;;  %v563_v54 = vpop.xlane.xlu0 %562  ;;  %v1270_v56 = vpop.eup %940 }
 0x277   : > { %950 = vpow2.f32 %v602_v52  ;;  %v582_v55 = vsub.f32 %v1238_v7, %v563_v54 }
 0x278   : > { %v565_v57 = vpop.xlane.xlu1 %564  ;;  %952 = vpow2.f32 %v604_v53 }
 0x279   : > { %v1272_v58 = vpop.eup %942  ;;  %v610_v59 = vmul.f32 1.442695, %v582_v55  ;;  %v583_v60 = vsub.f32 %v1240_v10, %v565_v57  ;;  %632 = vadd.xlane.f32.xlu1 %v1270_v56 }
 0x27a   : > { %626 = vadd.xlane.f32.xlu0 %v1272_v58  ;;  %v567_v61 = vpop.xlane.xlu0 %566  ;;  %v1278_v0 = vpop.eup %944 }
 0x27b   : > { %954 = vpow2.f32 %v610_v59  ;;  %v612_v62 = vmul.f32 1.442695, %v583_v60  ;;  %v584_v63 = vsub.f32 %v1243_v11, %v567_v61 }
 0x27c   : > { %v569_v1 = vpop.xlane.xlu1 %568 }
 0x27d   : > { %v1280_v2 = vpop.eup %946  ;;  %956 = vpow2.f32 %v612_v62  ;;  %v614_v3 = vmul.f32 1.442695, %v584_v63  ;;  %v585_v4 = vsub.f32 %v1246_v12, %v569_v1  ;;  %628 = vadd.xlane.f32.xlu1 %v1278_v0 }
 0x27e   : > { %638 = vadd.xlane.f32.xlu0 %v1280_v2  ;;  %v1285_v6 = vpop.eup %948 }
 0x27f   : > { %958 = vpow2.f32 %v614_v3  ;;  %v616_v5 = vmul.f32 1.442695, %v585_v4 }
 0x281   : > { %v1287_v7 = vpop.eup %950  ;;  %960 = vpow2.f32 %v616_v5  ;;  %640 = vadd.xlane.f32.xlu1 %v1285_v6 }
 0x282   : > { %634 = vadd.xlane.f32.xlu0 %v1287_v7  ;;  %v1291_v8 = vpop.eup %952 }
 0x285   : > { %v1293_v9 = vpop.eup %954  ;;  %636 = vadd.xlane.f32.xlu1 %v1291_v8 }
 0x286   : > { %642 = vadd.xlane.f32.xlu0 %v1293_v9 }
 0x287   : > { %v1297_v10 = vpop.eup %956 }
 0x289   : > { %v1299_v11 = vpop.eup %958  ;;  %644 = vadd.xlane.f32.xlu1 %v1297_v10 }
 0x28a   : > { %646 = vadd.xlane.f32.xlu0 %v1299_v11 }
 0x28b   : > { %v1303_v12 = vpop.eup %960 }
 0x28d   : > { %648 = vadd.xlane.f32.xlu1 %v1303_v12 }
 0x2fa   : > { %v623_v13 = vpop.xlane.xlu0 %622 }
 0x2fb   : > { %962 = vrcp.f32 %v623_v13 }
 0x2fe   : > { %v625_v14 = vpop.xlane.xlu1 %624  ;;  %v619_v15 = vpop.xlane.xlu0 %618 }
 0x2ff   : > { %964 = vrcp.f32 %v625_v14 }
 0x300   : > { %966 = vrcp.f32 %v619_v15 }
 0x302   : > { %v621_v16 = vpop.xlane.xlu1 %620 }
 0x303   : > { %968 = vrcp.f32 %v621_v16  ;;  %v631_v17 = vpop.xlane.xlu0 %630 }
 0x304   : > { %970 = vrcp.f32 %v631_v17 }
 0x305   : > { %v963_v18 = vpop.eup %962 }
 0x306   : > { %v668_v19 = vmul.f32 %v963_v18, %v1250_v34  ;;  %v633_v20 = vpop.xlane.xlu1 %632 }
 0x307   : > { %972 = vrcp.f32 %v633_v20  ;;  %v627_v21 = vpop.xlane.xlu0 %626 }
 0x308   : > { %684 = vst [vmem:[%s1310_s23 + $0x10] sm:$0xff] %v668_v19  ;;  %974 = vrcp.f32 %v627_v21 }
 0x309   : > { %v965_v22 = vpop.eup %964 }
 0x30a   : > { %v967_v23 = vpop.eup %966  ;;  %v669_v24 = vmul.f32 %v965_v22, %v1256_v42  ;;  %v629_v25 = vpop.xlane.xlu1 %628 }
 0x30b   : > { %v666_v26 = vmul.f32 %v967_v23, %v1253_v39  ;;  %976 = vrcp.f32 %v629_v25  ;;  %v639_v27 = vpop.xlane.xlu0 %638 }
 0x30c   : > { %685 = vst [vmem:[%s1310_s23 + $0x18] sm:$0xff] %v669_v24  ;;  %978 = vrcp.f32 %v639_v27 }
 0x30d   : > { %v969_v28 = vpop.eup %968  ;;  %682 = vst [vmem:[%s1310_s23] sm:$0xff] %v666_v26 }
 0x30e   : > { %v971_v29 = vpop.eup %970  ;;  %v667_v30 = vmul.f32 %v969_v28, %v1262_v49  ;;  %v641_v31 = vpop.xlane.xlu1 %640 }
 0x30f   : > { %v672_v32 = vmul.f32 %v971_v29, %v1265_v51  ;;  %980 = vrcp.f32 %v641_v31  ;;  %v635_v33 = vpop.xlane.xlu0 %634 }
 0x310   : > { %683 = vst [vmem:[%s1310_s23 + $0x8] sm:$0xff] %v667_v30  ;;  %982 = vrcp.f32 %v635_v33 }
 0x311   : > { %v973_v34 = vpop.eup %972  ;;  %688 = vst [vmem:[%s1310_s23 + $0x30] sm:$0xff] %v672_v32 }
 0x312   : > { %v975_v35 = vpop.eup %974  ;;  %v673_v36 = vmul.f32 %v973_v34, %v1270_v56  ;;  %v637_v37 = vpop.xlane.xlu1 %636 }
 0x313   : > { %v670_v38 = vmul.f32 %v975_v35, %v1272_v58  ;;  %984 = vrcp.f32 %v637_v37  ;;  %v643_v39 = vpop.xlane.xlu0 %642 }
 0x314   : > { %689 = vst [vmem:[%s1310_s23 + $0x38] sm:$0xff] %v673_v36  ;;  %986 = vrcp.f32 %v643_v39 }
 0x315   : > { %v977_v40 = vpop.eup %976  ;;  %686 = vst [vmem:[%s1310_s23 + $0x20] sm:$0xff] %v670_v38 }
 0x316   : > { %v979_v41 = vpop.eup %978  ;;  %v671_v42 = vmul.f32 %v977_v40, %v1278_v0  ;;  %v645_v43 = vpop.xlane.xlu1 %644 }
 0x317   : > { %v676_v44 = vmul.f32 %v979_v41, %v1280_v2  ;;  %988 = vrcp.f32 %v645_v43  ;;  %v647_v45 = vpop.xlane.xlu0 %646 }
 0x318   : > { %687 = vst [vmem:[%s1310_s23 + $0x28] sm:$0xff] %v671_v42  ;;  %990 = vrcp.f32 %v647_v45 }
 0x319   : > { %v981_v46 = vpop.eup %980  ;;  %692 = vst [vmem:[%s1310_s23 + $0x50] sm:$0xff] %v676_v44 }
 0x31a   : > { %v983_v47 = vpop.eup %982  ;;  %v677_v48 = vmul.f32 %v981_v46, %v1285_v6  ;;  %v649_v49 = vpop.xlane.xlu1 %648 }
 0x31b   : > { %v674_v50 = vmul.f32 %v983_v47, %v1287_v7  ;;  %992 = vrcp.f32 %v649_v49 }
 0x31c   : > { %693 = vst [vmem:[%s1310_s23 + $0x58] sm:$0xff] %v677_v48 }
 0x31d   : > { %v985_v51 = vpop.eup %984  ;;  %690 = vst [vmem:[%s1310_s23 + $0x40] sm:$0xff] %v674_v50 }
 0x31e   : > { %v987_v52 = vpop.eup %986  ;;  %v675_v53 = vmul.f32 %v985_v51, %v1291_v8 }
 0x31f   : > { %v678_v54 = vmul.f32 %v987_v52, %v1293_v9 }
 0x320   : > { %691 = vst [vmem:[%s1310_s23 + $0x48] sm:$0xff] %v675_v53 }
 0x321   : > { %v989_v55 = vpop.eup %988  ;;  %694 = vst [vmem:[%s1310_s23 + $0x60] sm:$0xff] %v678_v54 }
 0x322   : > { %v991_v56 = vpop.eup %990  ;;  %v679_v57 = vmul.f32 %v989_v55, %v1297_v10 }
 0x323   : > { %v680_v58 = vmul.f32 %v991_v56, %v1299_v11 }
 0x324   : > { %695 = vst [vmem:[%s1310_s23 + $0x68] sm:$0xff] %v679_v57 }
 0x325   : > { %v993_v59 = vpop.eup %992  ;;  %696 = vst [vmem:[%s1310_s23 + $0x70] sm:$0xff] %v680_v58 }
 0x326   : > { %v681_v60 = vmul.f32 %v993_v59, %v1303_v12 }
 0x328   : > { %697 = vst [vmem:[%s1310_s23 + $0x78] sm:$0xff] %v681_v60 }
 0x329   : > { %1007 = shalt.err (!%p1004_p3)
}
 0x32a   : > { %s1008_s12 = scalar_lea.hbm %s1346_s7, 2048  ;;  %s1012_s15 = scalar_lea.hbm %s1400_s5, 4096 }
 0x32b   : > { %p1009_p4 = scmp.ne.s32.totalorder %s1346_s7, %s1008_s12  ;;  %p1013_p9 = scmp.lt.u32.totalorder %s1346_s7, %s1400_s5 }
 0x32c   : > { %p1014_p10 = scmp.lt.u32.totalorder %s1012_s15, %s1008_s12  ;;  %p1016_p12 = scmp.lt.u32.totalorder %s1008_s12, %s1346_s7 }
 0x32d   : > { %p1010_p7 = pnand %p1009_p4, %p1129_p5 }
 0x32e   : > { %p1015_p11 = por %p1014_p10, %p1013_p9 }
 0x32f   : > { %p1011_p8 = pneg %p1010_p7 }
 0x330   : > { %p1017_p13 = por %p1016_p12, %p1015_p11 }
 0x332   : > { %p1018_p0 = pnand %p1017_p13, %p1011_p8 }
 0x334   : > { %1021 = shalt.err (!%p1018_p0)
}
 0x335   : > { %s1059_s23 = smov 128   ;;  %s1060_s25 = smov 8  }
 0x336   : > { %889 = dma.vmem_to_hbm [thread:$0]  (%p1129_p5), %s1348_s26, 2048, %s1346_s7, %s1354_s22, %s1059_s23, %s1059_s23, %s1060_s25  }
 0x337 PF: > { %p895_p1 = scmp.ge.s32.totalorder %s1056_s21, 2  ;;  %s727_s30 = sand.u32 1, %s1044_s18  }
 0x338   : > { %s728_s6 = scalar_lea.sflag [#allocation3], %s727_s30 }
 0x339   : > { %p892_p2 = pnand %p895_p1, %p1133_p6 }
 0x33b   : > { %1039 = dma.done.wait (!%p892_p2), %s728_s6, 2048  }
 0x33c   : > { %1041 = vsyncadd (!%p892_p2), %s728_s6, 4294965248  ;;  %p15_p3 = scmp.ge.s32.totalorder %s1116_s24, 4   ;;  %s1403_s18 = smov %s1048_s19 }
 0x33d   : > { %s1404_s19 = smov %s1052_s20  ;;  %s1405_s20 = smov %s1127_s27 }
 0x33e   : > { %s1406_s21 = smov %s1116_s24  ;;  %17 = sbr.rel (!%p15_p3) target bundleno = 3 (0x3), region = 75 }
 0x345   :  { %733 = vsyncpa [#allocation3], 1 }
 0x346   :  { %735 = vsyncpa [#allocation3 + $0x1], 1 }

</bundles_post_ra>
